<compile_context>
chip_gen: v6e
topology: v6e:2x2x1
jax: 0.10.0
libtpu: 0.0.40
codegen_flags: <defaults>
</compile_context>

<pallas_src>
import functools

import numpy as np
import jax
import jax.numpy as jnp
from jax.experimental import pallas as pl
from jax.experimental.pallas import tpu as pltpu

NEG_SLOPE = 0.01   # PyTorch nn.LeakyReLU default
BN_EPS = 1e-5      # PyTorch nn.BatchNorm2d default


def _conv_bn_lrelu_kernel(x_ref, w_ref, b_ref, m_ref, o_ref,
                          *, H, W, KH, KW, C_in):
    # x_ref : (C_in, H*W)           one image, spatial flattened onto lanes
    # w_ref : (C_out, KH*KW*C_in)   BN-scale-folded weights, col = (kh*KW+kw)*C_in+ci
    # b_ref : (C_out, 1)            folded BN bias
    # m_ref : (KH*KW, H*W)          per-tap border masks (1.0 = valid, 0.0 = padded)
    # o_ref : (C_out, H*W)
    HW = H * W
    x = x_ref[...]                                   # (C_in, HW), dense vregs
    ph, pw = (KH - 1) // 2, (KW - 1) // 2

    acc = None
    for kh in range(KH):
        dh = kh - ph
        for kw in range(KW):
            dw = kw - pw
            tap = kh * KW + kw
            s = dh * W + dw                          # flat-index source offset
            if s == 0:
                patch = x                            # center tap: no shift, no mask
            else:
                # shifted[p] = x[(p + s) mod HW]  (wrap-around zeroed by the mask)
                shifted = pltpu.roll(x, shift=(-s) % HW, axis=1)   # XLU rotate
                patch = shifted * m_ref[tap:tap + 1, :]            # zero "same"-pad halo
            base = tap * C_in
            for ci in range(C_in):
                # outer-product broadcast FMA on the VPU:
                # (C_out,1) weight column  x  (1,HW) input row  ->  (C_out,HW)
                term = w_ref[:, base + ci:base + ci + 1] * patch[ci:ci + 1, :]
                acc = term if acc is None else acc + term

    y = acc + b_ref[...]                             # folded BN bias
    y = jnp.where(y > 0, y, NEG_SLOPE * y)           # LeakyReLU(0.01)
    o_ref[...] = y.astype(o_ref.dtype)               # lane-dense (C_out, HW) store


@functools.partial(jax.jit, static_argnames=("stride",))
def conv_bn_relu_pallas(x_nchw, weight_oihw, gamma, beta, running_mean, running_var,
                        *, stride=1):
    """Forward pass matching ConvBnReLU (BatchNorm in eval mode, stats folded)."""
    B, C_in, H, W = x_nchw.shape
    C_out, C_in_w, KH, KW = weight_oihw.shape
    assert C_in == C_in_w
    assert stride == 1, "Pallas path implements the module's default stride=1"
    # TODO(synk): stride > 1 not implemented (module default is stride=1).
    HW = H * W
    ph, pw = (KH - 1) // 2, (KW - 1) // 2

    # ---- one-time folds (wrapper side, trivial cost, no activation HBM traffic) ----
    scale = gamma * jax.lax.rsqrt(running_var + BN_EPS)                 # (C_out,)
    w_fold = (jnp.transpose(weight_oihw, (0, 2, 3, 1))                  # (C_out,KH,KW,C_in)
              .reshape(C_out, KH * KW * C_in)
              * scale[:, None]).astype(jnp.float32)                     # fold BN scale
    bias = (beta - running_mean * scale).reshape(C_out, 1).astype(jnp.float32)

    # Per-tap validity masks for "same" zero padding (static; constant under jit).
    masks_np = np.zeros((KH * KW, HW), np.float32)
    for kh in range(KH):
        dh = kh - ph
        for kw in range(KW):
            dw = kw - pw
            m = np.zeros((H, W), np.float32)
            h0, h1 = max(0, -dh), min(H, H - dh)
            w0, w1 = max(0, -dw), min(W, W - dw)
            m[h0:h1, w0:w1] = 1.0
            masks_np[kh * KW + kw] = m.reshape(-1)
    masks = jnp.asarray(masks_np)

    # NCHW -> NC(HW): pure reshape, no transpose, no pad.
    x_flat = x_nchw.reshape(B, C_in, HW)

    kernel = functools.partial(_conv_bn_lrelu_kernel,
                               H=H, W=W, KH=KH, KW=KW, C_in=C_in)

    out_flat = pl.pallas_call(
        kernel,
        out_shape=jax.ShapeDtypeStruct((B, C_out, HW), x_nchw.dtype),
        grid_spec=pltpu.PrefetchScalarGridSpec(
            num_scalar_prefetch=0,
            grid=(B,),
            in_specs=[
                pl.BlockSpec((pl.Squeezed(), C_in, HW), lambda b: (b, 0, 0)),
                pl.BlockSpec((C_out, KH * KW * C_in), lambda b: (0, 0)),
                pl.BlockSpec((C_out, 1), lambda b: (0, 0)),
                pl.BlockSpec((KH * KW, HW), lambda b: (0, 0)),
            ],
            out_specs=pl.BlockSpec((pl.Squeezed(), C_out, HW), lambda b: (b, 0, 0)),
        ),
        compiler_params=pltpu.CompilerParams(
            dimension_semantics=("parallel",)),
    )(x_flat, w_fold, bias, masks)

    # (B, C_out, HW) -> (B, C_out, H, W): free reshape, output is already NCHW order.
    return out_flat.reshape(B, C_out, H, W)


def _reference(x_nchw, weight_oihw, gamma, beta, running_mean, running_var, *, stride=1):
    pad = (weight_oihw.shape[2] - 1) // 2
    y = jax.lax.conv_general_dilated(
        x_nchw, weight_oihw,
        window_strides=(stride, stride),
        padding=((pad, pad), (pad, pad)),
        dimension_numbers=("NCHW", "OIHW", "NCHW"))
    scale = gamma / jnp.sqrt(running_var + BN_EPS)
    bias = beta - running_mean * scale
    y = y * scale[None, :, None, None] + bias[None, :, None, None]
    return jnp.where(y > 0, y, NEG_SLOPE * y)


if __name__ == "__main__":
    # ConvBnReLU(input_channel=4, output_channel=8, kernel_size=3, stride=1)
    B, C_in, C_out, H, W, K = 2, 4, 8, 16, 16, 3

    key = jax.random.PRNGKey(0)
    k_x, k_w, k_g, k_b, k_m, k_v = jax.random.split(key, 6)

    x = jax.random.normal(k_x, (B, C_in, H, W), dtype=jnp.float32)
    weight = jax.random.normal(k_w, (C_out, C_in, K, K), dtype=jnp.float32) * 0.1
    gamma = 1.0 + 0.1 * jax.random.normal(k_g, (C_out,), dtype=jnp.float32)
    beta = 0.1 * jax.random.normal(k_b, (C_out,), dtype=jnp.float32)
    running_mean = 0.1 * jax.random.normal(k_m, (C_out,), dtype=jnp.float32)
    running_var = jnp.abs(1.0 + 0.1 * jax.random.normal(k_v, (C_out,), dtype=jnp.float32))

    out = conv_bn_relu_pallas(x, weight, gamma, beta, running_mean, running_var, stride=1)
    out = jax.block_until_ready(out)

    ref = _reference(x, weight, gamma, beta, running_mean, running_var, stride=1)
    assert out.shape == (B, C_out, H, W)
    assert jnp.allclose(out, ref, rtol=1e-4, atol=1e-4), "mismatch vs reference"

    print("KERNEL_OK")
</pallas_src>

<mosaic_0001>
module attributes {stable_mosaic.version = 11 : i64} {
  func.func @_conv_bn_lrelu_kernel(%arg0: i32, %arg1: memref<1x4x256xf32, #tpu.memory_space<vmem>>, %arg2: memref<8x36xf32, #tpu.memory_space<vmem>>, %arg3: memref<8x1xf32, #tpu.memory_space<vmem>>, %arg4: memref<9x256xf32, #tpu.memory_space<vmem>>, %arg5: memref<1x8x256xf32, #tpu.memory_space<vmem>>) attributes {dimension_semantics = [#tpu.dimension_semantics<parallel>], iteration_bounds = array<i64: 2>, scalar_prefetch = 0 : i64, scratch_operands = 0 : i64, tpu.core_type = #tpu.core_type<tc>, window_params = [{transform_indices = @transform_0, window_bounds = array<i64: 1, 4, 256>}, {pipeline_mode = #tpu.pipeline_mode<synchronous>, transform_indices = @transform_1, window_bounds = array<i64: 8, 36>}, {pipeline_mode = #tpu.pipeline_mode<synchronous>, transform_indices = @transform_2, window_bounds = array<i64: 8, 1>}, {pipeline_mode = #tpu.pipeline_mode<synchronous>, transform_indices = @transform_3, window_bounds = array<i64: 9, 256>}, {transform_indices = @transform_4, window_bounds = array<i64: 1, 8, 256>}]} {
    %c0 = arith.constant 0 : index
    %c0_0 = arith.constant 0 : index
    %c0_1 = arith.constant 0 : index
    %0 = vector.load %arg1[%c0, %c0_0, %c0_1] : memref<1x4x256xf32, #tpu.memory_space<vmem>>, vector<1x4x256xf32>
    %1 = vector.shape_cast %0 : vector<1x4x256xf32> to vector<4x256xf32>
    %c17_i32 = arith.constant 17 : i32
    %2 = tpu.dynamic_rotate %1 by %c17_i32 dim 1 : vector<4x256xf32>, i32 -> vector<4x256xf32>
    %c0_2 = arith.constant 0 : index
    %c0_3 = arith.constant 0 : index
    %3 = vector.load %arg4[%c0_2, %c0_3] : memref<9x256xf32, #tpu.memory_space<vmem>>, vector<1x256xf32>
    %4 = vector.broadcast %3 : vector<1x256xf32> to vector<4x256xf32>
    %5 = arith.mulf %2, %4 : vector<4x256xf32>
    %c0_4 = arith.constant 0 : index
    %c0_5 = arith.constant 0 : index
    %6 = vector.load %arg2[%c0_4, %c0_5] : memref<8x36xf32, #tpu.memory_space<vmem>>, vector<8x1xf32>
    %7 = vector.extract_strided_slice %5 {offsets = [0, 0], sizes = [1, 256], strides = [1, 1]} : vector<4x256xf32> to vector<1x256xf32>
    %8 = vector.broadcast %6 : vector<8x1xf32> to vector<8x256xf32>
    %9 = vector.broadcast %7 : vector<1x256xf32> to vector<8x256xf32>
    %10 = arith.mulf %8, %9 : vector<8x256xf32>
    %c0_6 = arith.constant 0 : index
    %c1 = arith.constant 1 : index
    %11 = vector.load %arg2[%c0_6, %c1] : memref<8x36xf32, #tpu.memory_space<vmem>>, vector<8x1xf32>
    %12 = vector.extract_strided_slice %5 {offsets = [1, 0], sizes = [1, 256], strides = [1, 1]} : vector<4x256xf32> to vector<1x256xf32>
    %13 = vector.broadcast %11 : vector<8x1xf32> to vector<8x256xf32>
    %14 = vector.broadcast %12 : vector<1x256xf32> to vector<8x256xf32>
    %15 = arith.mulf %13, %14 : vector<8x256xf32>
    %16 = arith.addf %10, %15 : vector<8x256xf32>
    %c0_7 = arith.constant 0 : index
    %c2 = arith.constant 2 : index
    %17 = vector.load %arg2[%c0_7, %c2] : memref<8x36xf32, #tpu.memory_space<vmem>>, vector<8x1xf32>
    %18 = vector.extract_strided_slice %5 {offsets = [2, 0], sizes = [1, 256], strides = [1, 1]} : vector<4x256xf32> to vector<1x256xf32>
    %19 = vector.broadcast %17 : vector<8x1xf32> to vector<8x256xf32>
    %20 = vector.broadcast %18 : vector<1x256xf32> to vector<8x256xf32>
    %21 = arith.mulf %19, %20 : vector<8x256xf32>
    %22 = arith.addf %16, %21 : vector<8x256xf32>
    %c0_8 = arith.constant 0 : index
    %c3 = arith.constant 3 : index
    %23 = vector.load %arg2[%c0_8, %c3] : memref<8x36xf32, #tpu.memory_space<vmem>>, vector<8x1xf32>
    %24 = vector.extract_strided_slice %5 {offsets = [3, 0], sizes = [1, 256], strides = [1, 1]} : vector<4x256xf32> to vector<1x256xf32>
    %25 = vector.broadcast %23 : vector<8x1xf32> to vector<8x256xf32>
    %26 = vector.broadcast %24 : vector<1x256xf32> to vector<8x256xf32>
    %27 = arith.mulf %25, %26 : vector<8x256xf32>
    %28 = arith.addf %22, %27 : vector<8x256xf32>
    %c16_i32 = arith.constant 16 : i32
    %29 = tpu.dynamic_rotate %1 by %c16_i32 dim 1 : vector<4x256xf32>, i32 -> vector<4x256xf32>
    %c1_9 = arith.constant 1 : index
    %c0_10 = arith.constant 0 : index
    %30 = vector.load %arg4[%c1_9, %c0_10] : memref<9x256xf32, #tpu.memory_space<vmem>>, vector<1x256xf32>
    %31 = vector.broadcast %30 : vector<1x256xf32> to vector<4x256xf32>
    %32 = arith.mulf %29, %31 : vector<4x256xf32>
    %c0_11 = arith.constant 0 : index
    %c4 = arith.constant 4 : index
    %33 = vector.load %arg2[%c0_11, %c4] : memref<8x36xf32, #tpu.memory_space<vmem>>, vector<8x1xf32>
    %34 = vector.extract_strided_slice %32 {offsets = [0, 0], sizes = [1, 256], strides = [1, 1]} : vector<4x256xf32> to vector<1x256xf32>
    %35 = vector.broadcast %33 : vector<8x1xf32> to vector<8x256xf32>
    %36 = vector.broadcast %34 : vector<1x256xf32> to vector<8x256xf32>
    %37 = arith.mulf %35, %36 : vector<8x256xf32>
    %38 = arith.addf %28, %37 : vector<8x256xf32>
    %c0_12 = arith.constant 0 : index
    %c5 = arith.constant 5 : index
    %39 = vector.load %arg2[%c0_12, %c5] : memref<8x36xf32, #tpu.memory_space<vmem>>, vector<8x1xf32>
    %40 = vector.extract_strided_slice %32 {offsets = [1, 0], sizes = [1, 256], strides = [1, 1]} : vector<4x256xf32> to vector<1x256xf32>
    %41 = vector.broadcast %39 : vector<8x1xf32> to vector<8x256xf32>
    %42 = vector.broadcast %40 : vector<1x256xf32> to vector<8x256xf32>
    %43 = arith.mulf %41, %42 : vector<8x256xf32>
    %44 = arith.addf %38, %43 : vector<8x256xf32>
    %c0_13 = arith.constant 0 : index
    %c6 = arith.constant 6 : index
    %45 = vector.load %arg2[%c0_13, %c6] : memref<8x36xf32, #tpu.memory_space<vmem>>, vector<8x1xf32>
    %46 = vector.extract_strided_slice %32 {offsets = [2, 0], sizes = [1, 256], strides = [1, 1]} : vector<4x256xf32> to vector<1x256xf32>
    %47 = vector.broadcast %45 : vector<8x1xf32> to vector<8x256xf32>
    %48 = vector.broadcast %46 : vector<1x256xf32> to vector<8x256xf32>
    %49 = arith.mulf %47, %48 : vector<8x256xf32>
    %50 = arith.addf %44, %49 : vector<8x256xf32>
    %c0_14 = arith.constant 0 : index
    %c7 = arith.constant 7 : index
    %51 = vector.load %arg2[%c0_14, %c7] : memref<8x36xf32, #tpu.memory_space<vmem>>, vector<8x1xf32>
    %52 = vector.extract_strided_slice %32 {offsets = [3, 0], sizes = [1, 256], strides = [1, 1]} : vector<4x256xf32> to vector<1x256xf32>
    %53 = vector.broadcast %51 : vector<8x1xf32> to vector<8x256xf32>
    %54 = vector.broadcast %52 : vector<1x256xf32> to vector<8x256xf32>
    %55 = arith.mulf %53, %54 : vector<8x256xf32>
    %56 = arith.addf %50, %55 : vector<8x256xf32>
    %c15_i32 = arith.constant 15 : i32
    %57 = tpu.dynamic_rotate %1 by %c15_i32 dim 1 : vector<4x256xf32>, i32 -> vector<4x256xf32>
    %c2_15 = arith.constant 2 : index
    %c0_16 = arith.constant 0 : index
    %58 = vector.load %arg4[%c2_15, %c0_16] : memref<9x256xf32, #tpu.memory_space<vmem>>, vector<1x256xf32>
    %59 = vector.broadcast %58 : vector<1x256xf32> to vector<4x256xf32>
    %60 = arith.mulf %57, %59 : vector<4x256xf32>
    %c0_17 = arith.constant 0 : index
    %c8 = arith.constant 8 : index
    %61 = vector.load %arg2[%c0_17, %c8] : memref<8x36xf32, #tpu.memory_space<vmem>>, vector<8x1xf32>
    %62 = vector.extract_strided_slice %60 {offsets = [0, 0], sizes = [1, 256], strides = [1, 1]} : vector<4x256xf32> to vector<1x256xf32>
    %63 = vector.broadcast %61 : vector<8x1xf32> to vector<8x256xf32>
    %64 = vector.broadcast %62 : vector<1x256xf32> to vector<8x256xf32>
    %65 = arith.mulf %63, %64 : vector<8x256xf32>
    %66 = arith.addf %56, %65 : vector<8x256xf32>
    %c0_18 = arith.constant 0 : index
    %c9 = arith.constant 9 : index
    %67 = vector.load %arg2[%c0_18, %c9] : memref<8x36xf32, #tpu.memory_space<vmem>>, vector<8x1xf32>
    %68 = vector.extract_strided_slice %60 {offsets = [1, 0], sizes = [1, 256], strides = [1, 1]} : vector<4x256xf32> to vector<1x256xf32>
    %69 = vector.broadcast %67 : vector<8x1xf32> to vector<8x256xf32>
    %70 = vector.broadcast %68 : vector<1x256xf32> to vector<8x256xf32>
    %71 = arith.mulf %69, %70 : vector<8x256xf32>
    %72 = arith.addf %66, %71 : vector<8x256xf32>
    %c0_19 = arith.constant 0 : index
    %c10 = arith.constant 10 : index
    %73 = vector.load %arg2[%c0_19, %c10] : memref<8x36xf32, #tpu.memory_space<vmem>>, vector<8x1xf32>
    %74 = vector.extract_strided_slice %60 {offsets = [2, 0], sizes = [1, 256], strides = [1, 1]} : vector<4x256xf32> to vector<1x256xf32>
    %75 = vector.broadcast %73 : vector<8x1xf32> to vector<8x256xf32>
    %76 = vector.broadcast %74 : vector<1x256xf32> to vector<8x256xf32>
    %77 = arith.mulf %75, %76 : vector<8x256xf32>
    %78 = arith.addf %72, %77 : vector<8x256xf32>
    %c0_20 = arith.constant 0 : index
    %c11 = arith.constant 11 : index
    %79 = vector.load %arg2[%c0_20, %c11] : memref<8x36xf32, #tpu.memory_space<vmem>>, vector<8x1xf32>
    %80 = vector.extract_strided_slice %60 {offsets = [3, 0], sizes = [1, 256], strides = [1, 1]} : vector<4x256xf32> to vector<1x256xf32>
    %81 = vector.broadcast %79 : vector<8x1xf32> to vector<8x256xf32>
    %82 = vector.broadcast %80 : vector<1x256xf32> to vector<8x256xf32>
    %83 = arith.mulf %81, %82 : vector<8x256xf32>
    %84 = arith.addf %78, %83 : vector<8x256xf32>
    %c1_i32 = arith.constant 1 : i32
    %85 = tpu.dynamic_rotate %1 by %c1_i32 dim 1 : vector<4x256xf32>, i32 -> vector<4x256xf32>
    %c3_21 = arith.constant 3 : index
    %c0_22 = arith.constant 0 : index
    %86 = vector.load %arg4[%c3_21, %c0_22] : memref<9x256xf32, #tpu.memory_space<vmem>>, vector<1x256xf32>
    %87 = vector.broadcast %86 : vector<1x256xf32> to vector<4x256xf32>
    %88 = arith.mulf %85, %87 : vector<4x256xf32>
    %c0_23 = arith.constant 0 : index
    %c12 = arith.constant 12 : index
    %89 = vector.load %arg2[%c0_23, %c12] : memref<8x36xf32, #tpu.memory_space<vmem>>, vector<8x1xf32>
    %90 = vector.extract_strided_slice %88 {offsets = [0, 0], sizes = [1, 256], strides = [1, 1]} : vector<4x256xf32> to vector<1x256xf32>
    %91 = vector.broadcast %89 : vector<8x1xf32> to vector<8x256xf32>
    %92 = vector.broadcast %90 : vector<1x256xf32> to vector<8x256xf32>
    %93 = arith.mulf %91, %92 : vector<8x256xf32>
    %94 = arith.addf %84, %93 : vector<8x256xf32>
    %c0_24 = arith.constant 0 : index
    %c13 = arith.constant 13 : index
    %95 = vector.load %arg2[%c0_24, %c13] : memref<8x36xf32, #tpu.memory_space<vmem>>, vector<8x1xf32>
    %96 = vector.extract_strided_slice %88 {offsets = [1, 0], sizes = [1, 256], strides = [1, 1]} : vector<4x256xf32> to vector<1x256xf32>
    %97 = vector.broadcast %95 : vector<8x1xf32> to vector<8x256xf32>
    %98 = vector.broadcast %96 : vector<1x256xf32> to vector<8x256xf32>
    %99 = arith.mulf %97, %98 : vector<8x256xf32>
    %100 = arith.addf %94, %99 : vector<8x256xf32>
    %c0_25 = arith.constant 0 : index
    %c14 = arith.constant 14 : index
    %101 = vector.load %arg2[%c0_25, %c14] : memref<8x36xf32, #tpu.memory_space<vmem>>, vector<8x1xf32>
    %102 = vector.extract_strided_slice %88 {offsets = [2, 0], sizes = [1, 256], strides = [1, 1]} : vector<4x256xf32> to vector<1x256xf32>
    %103 = vector.broadcast %101 : vector<8x1xf32> to vector<8x256xf32>
    %104 = vector.broadcast %102 : vector<1x256xf32> to vector<8x256xf32>
    %105 = arith.mulf %103, %104 : vector<8x256xf32>
    %106 = arith.addf %100, %105 : vector<8x256xf32>
    %c0_26 = arith.constant 0 : index
    %c15 = arith.constant 15 : index
    %107 = vector.load %arg2[%c0_26, %c15] : memref<8x36xf32, #tpu.memory_space<vmem>>, vector<8x1xf32>
    %108 = vector.extract_strided_slice %88 {offsets = [3, 0], sizes = [1, 256], strides = [1, 1]} : vector<4x256xf32> to vector<1x256xf32>
    %109 = vector.broadcast %107 : vector<8x1xf32> to vector<8x256xf32>
    %110 = vector.broadcast %108 : vector<1x256xf32> to vector<8x256xf32>
    %111 = arith.mulf %109, %110 : vector<8x256xf32>
    %112 = arith.addf %106, %111 : vector<8x256xf32>
    %c0_27 = arith.constant 0 : index
    %c16 = arith.constant 16 : index
    %113 = vector.load %arg2[%c0_27, %c16] : memref<8x36xf32, #tpu.memory_space<vmem>>, vector<8x1xf32>
    %114 = vector.extract_strided_slice %1 {offsets = [0, 0], sizes = [1, 256], strides = [1, 1]} : vector<4x256xf32> to vector<1x256xf32>
    %115 = vector.broadcast %113 : vector<8x1xf32> to vector<8x256xf32>
    %116 = vector.broadcast %114 : vector<1x256xf32> to vector<8x256xf32>
    %117 = arith.mulf %115, %116 : vector<8x256xf32>
    %118 = arith.addf %112, %117 : vector<8x256xf32>
    %c0_28 = arith.constant 0 : index
    %c17 = arith.constant 17 : index
    %119 = vector.load %arg2[%c0_28, %c17] : memref<8x36xf32, #tpu.memory_space<vmem>>, vector<8x1xf32>
    %120 = vector.extract_strided_slice %1 {offsets = [1, 0], sizes = [1, 256], strides = [1, 1]} : vector<4x256xf32> to vector<1x256xf32>
    %121 = vector.broadcast %119 : vector<8x1xf32> to vector<8x256xf32>
    %122 = vector.broadcast %120 : vector<1x256xf32> to vector<8x256xf32>
    %123 = arith.mulf %121, %122 : vector<8x256xf32>
    %124 = arith.addf %118, %123 : vector<8x256xf32>
    %c0_29 = arith.constant 0 : index
    %c18 = arith.constant 18 : index
    %125 = vector.load %arg2[%c0_29, %c18] : memref<8x36xf32, #tpu.memory_space<vmem>>, vector<8x1xf32>
    %126 = vector.extract_strided_slice %1 {offsets = [2, 0], sizes = [1, 256], strides = [1, 1]} : vector<4x256xf32> to vector<1x256xf32>
    %127 = vector.broadcast %125 : vector<8x1xf32> to vector<8x256xf32>
    %128 = vector.broadcast %126 : vector<1x256xf32> to vector<8x256xf32>
    %129 = arith.mulf %127, %128 : vector<8x256xf32>
    %130 = arith.addf %124, %129 : vector<8x256xf32>
    %c0_30 = arith.constant 0 : index
    %c19 = arith.constant 19 : index
    %131 = vector.load %arg2[%c0_30, %c19] : memref<8x36xf32, #tpu.memory_space<vmem>>, vector<8x1xf32>
    %132 = vector.extract_strided_slice %1 {offsets = [3, 0], sizes = [1, 256], strides = [1, 1]} : vector<4x256xf32> to vector<1x256xf32>
    %133 = vector.broadcast %131 : vector<8x1xf32> to vector<8x256xf32>
    %134 = vector.broadcast %132 : vector<1x256xf32> to vector<8x256xf32>
    %135 = arith.mulf %133, %134 : vector<8x256xf32>
    %136 = arith.addf %130, %135 : vector<8x256xf32>
    %c255_i32 = arith.constant 255 : i32
    %137 = tpu.dynamic_rotate %1 by %c255_i32 dim 1 : vector<4x256xf32>, i32 -> vector<4x256xf32>
    %c5_31 = arith.constant 5 : index
    %c0_32 = arith.constant 0 : index
    %138 = vector.load %arg4[%c5_31, %c0_32] : memref<9x256xf32, #tpu.memory_space<vmem>>, vector<1x256xf32>
    %139 = vector.broadcast %138 : vector<1x256xf32> to vector<4x256xf32>
    %140 = arith.mulf %137, %139 : vector<4x256xf32>
    %c0_33 = arith.constant 0 : index
    %c20 = arith.constant 20 : index
    %141 = vector.load %arg2[%c0_33, %c20] : memref<8x36xf32, #tpu.memory_space<vmem>>, vector<8x1xf32>
    %142 = vector.extract_strided_slice %140 {offsets = [0, 0], sizes = [1, 256], strides = [1, 1]} : vector<4x256xf32> to vector<1x256xf32>
    %143 = vector.broadcast %141 : vector<8x1xf32> to vector<8x256xf32>
    %144 = vector.broadcast %142 : vector<1x256xf32> to vector<8x256xf32>
    %145 = arith.mulf %143, %144 : vector<8x256xf32>
    %146 = arith.addf %136, %145 : vector<8x256xf32>
    %c0_34 = arith.constant 0 : index
    %c21 = arith.constant 21 : index
    %147 = vector.load %arg2[%c0_34, %c21] : memref<8x36xf32, #tpu.memory_space<vmem>>, vector<8x1xf32>
    %148 = vector.extract_strided_slice %140 {offsets = [1, 0], sizes = [1, 256], strides = [1, 1]} : vector<4x256xf32> to vector<1x256xf32>
    %149 = vector.broadcast %147 : vector<8x1xf32> to vector<8x256xf32>
    %150 = vector.broadcast %148 : vector<1x256xf32> to vector<8x256xf32>
    %151 = arith.mulf %149, %150 : vector<8x256xf32>
    %152 = arith.addf %146, %151 : vector<8x256xf32>
    %c0_35 = arith.constant 0 : index
    %c22 = arith.constant 22 : index
    %153 = vector.load %arg2[%c0_35, %c22] : memref<8x36xf32, #tpu.memory_space<vmem>>, vector<8x1xf32>
    %154 = vector.extract_strided_slice %140 {offsets = [2, 0], sizes = [1, 256], strides = [1, 1]} : vector<4x256xf32> to vector<1x256xf32>
    %155 = vector.broadcast %153 : vector<8x1xf32> to vector<8x256xf32>
    %156 = vector.broadcast %154 : vector<1x256xf32> to vector<8x256xf32>
    %157 = arith.mulf %155, %156 : vector<8x256xf32>
    %158 = arith.addf %152, %157 : vector<8x256xf32>
    %c0_36 = arith.constant 0 : index
    %c23 = arith.constant 23 : index
    %159 = vector.load %arg2[%c0_36, %c23] : memref<8x36xf32, #tpu.memory_space<vmem>>, vector<8x1xf32>
    %160 = vector.extract_strided_slice %140 {offsets = [3, 0], sizes = [1, 256], strides = [1, 1]} : vector<4x256xf32> to vector<1x256xf32>
    %161 = vector.broadcast %159 : vector<8x1xf32> to vector<8x256xf32>
    %162 = vector.broadcast %160 : vector<1x256xf32> to vector<8x256xf32>
    %163 = arith.mulf %161, %162 : vector<8x256xf32>
    %164 = arith.addf %158, %163 : vector<8x256xf32>
    %c241_i32 = arith.constant 241 : i32
    %165 = tpu.dynamic_rotate %1 by %c241_i32 dim 1 : vector<4x256xf32>, i32 -> vector<4x256xf32>
    %c6_37 = arith.constant 6 : index
    %c0_38 = arith.constant 0 : index
    %166 = vector.load %arg4[%c6_37, %c0_38] : memref<9x256xf32, #tpu.memory_space<vmem>>, vector<1x256xf32>
    %167 = vector.broadcast %166 : vector<1x256xf32> to vector<4x256xf32>
    %168 = arith.mulf %165, %167 : vector<4x256xf32>
    %c0_39 = arith.constant 0 : index
    %c24 = arith.constant 24 : index
    %169 = vector.load %arg2[%c0_39, %c24] : memref<8x36xf32, #tpu.memory_space<vmem>>, vector<8x1xf32>
    %170 = vector.extract_strided_slice %168 {offsets = [0, 0], sizes = [1, 256], strides = [1, 1]} : vector<4x256xf32> to vector<1x256xf32>
    %171 = vector.broadcast %169 : vector<8x1xf32> to vector<8x256xf32>
    %172 = vector.broadcast %170 : vector<1x256xf32> to vector<8x256xf32>
    %173 = arith.mulf %171, %172 : vector<8x256xf32>
    %174 = arith.addf %164, %173 : vector<8x256xf32>
    %c0_40 = arith.constant 0 : index
    %c25 = arith.constant 25 : index
    %175 = vector.load %arg2[%c0_40, %c25] : memref<8x36xf32, #tpu.memory_space<vmem>>, vector<8x1xf32>
    %176 = vector.extract_strided_slice %168 {offsets = [1, 0], sizes = [1, 256], strides = [1, 1]} : vector<4x256xf32> to vector<1x256xf32>
    %177 = vector.broadcast %175 : vector<8x1xf32> to vector<8x256xf32>
    %178 = vector.broadcast %176 : vector<1x256xf32> to vector<8x256xf32>
    %179 = arith.mulf %177, %178 : vector<8x256xf32>
    %180 = arith.addf %174, %179 : vector<8x256xf32>
    %c0_41 = arith.constant 0 : index
    %c26 = arith.constant 26 : index
    %181 = vector.load %arg2[%c0_41, %c26] : memref<8x36xf32, #tpu.memory_space<vmem>>, vector<8x1xf32>
    %182 = vector.extract_strided_slice %168 {offsets = [2, 0], sizes = [1, 256], strides = [1, 1]} : vector<4x256xf32> to vector<1x256xf32>
    %183 = vector.broadcast %181 : vector<8x1xf32> to vector<8x256xf32>
    %184 = vector.broadcast %182 : vector<1x256xf32> to vector<8x256xf32>
    %185 = arith.mulf %183, %184 : vector<8x256xf32>
    %186 = arith.addf %180, %185 : vector<8x256xf32>
    %c0_42 = arith.constant 0 : index
    %c27 = arith.constant 27 : index
    %187 = vector.load %arg2[%c0_42, %c27] : memref<8x36xf32, #tpu.memory_space<vmem>>, vector<8x1xf32>
    %188 = vector.extract_strided_slice %168 {offsets = [3, 0], sizes = [1, 256], strides = [1, 1]} : vector<4x256xf32> to vector<1x256xf32>
    %189 = vector.broadcast %187 : vector<8x1xf32> to vector<8x256xf32>
    %190 = vector.broadcast %188 : vector<1x256xf32> to vector<8x256xf32>
    %191 = arith.mulf %189, %190 : vector<8x256xf32>
    %192 = arith.addf %186, %191 : vector<8x256xf32>
    %c240_i32 = arith.constant 240 : i32
    %193 = tpu.dynamic_rotate %1 by %c240_i32 dim 1 : vector<4x256xf32>, i32 -> vector<4x256xf32>
    %c7_43 = arith.constant 7 : index
    %c0_44 = arith.constant 0 : index
    %194 = vector.load %arg4[%c7_43, %c0_44] : memref<9x256xf32, #tpu.memory_space<vmem>>, vector<1x256xf32>
    %195 = vector.broadcast %194 : vector<1x256xf32> to vector<4x256xf32>
    %196 = arith.mulf %193, %195 : vector<4x256xf32>
    %c0_45 = arith.constant 0 : index
    %c28 = arith.constant 28 : index
    %197 = vector.load %arg2[%c0_45, %c28] : memref<8x36xf32, #tpu.memory_space<vmem>>, vector<8x1xf32>
    %198 = vector.extract_strided_slice %196 {offsets = [0, 0], sizes = [1, 256], strides = [1, 1]} : vector<4x256xf32> to vector<1x256xf32>
    %199 = vector.broadcast %197 : vector<8x1xf32> to vector<8x256xf32>
    %200 = vector.broadcast %198 : vector<1x256xf32> to vector<8x256xf32>
    %201 = arith.mulf %199, %200 : vector<8x256xf32>
    %202 = arith.addf %192, %201 : vector<8x256xf32>
    %c0_46 = arith.constant 0 : index
    %c29 = arith.constant 29 : index
    %203 = vector.load %arg2[%c0_46, %c29] : memref<8x36xf32, #tpu.memory_space<vmem>>, vector<8x1xf32>
    %204 = vector.extract_strided_slice %196 {offsets = [1, 0], sizes = [1, 256], strides = [1, 1]} : vector<4x256xf32> to vector<1x256xf32>
    %205 = vector.broadcast %203 : vector<8x1xf32> to vector<8x256xf32>
    %206 = vector.broadcast %204 : vector<1x256xf32> to vector<8x256xf32>
    %207 = arith.mulf %205, %206 : vector<8x256xf32>
    %208 = arith.addf %202, %207 : vector<8x256xf32>
    %c0_47 = arith.constant 0 : index
    %c30 = arith.constant 30 : index
    %209 = vector.load %arg2[%c0_47, %c30] : memref<8x36xf32, #tpu.memory_space<vmem>>, vector<8x1xf32>
    %210 = vector.extract_strided_slice %196 {offsets = [2, 0], sizes = [1, 256], strides = [1, 1]} : vector<4x256xf32> to vector<1x256xf32>
    %211 = vector.broadcast %209 : vector<8x1xf32> to vector<8x256xf32>
    %212 = vector.broadcast %210 : vector<1x256xf32> to vector<8x256xf32>
    %213 = arith.mulf %211, %212 : vector<8x256xf32>
    %214 = arith.addf %208, %213 : vector<8x256xf32>
    %c0_48 = arith.constant 0 : index
    %c31 = arith.constant 31 : index
    %215 = vector.load %arg2[%c0_48, %c31] : memref<8x36xf32, #tpu.memory_space<vmem>>, vector<8x1xf32>
    %216 = vector.extract_strided_slice %196 {offsets = [3, 0], sizes = [1, 256], strides = [1, 1]} : vector<4x256xf32> to vector<1x256xf32>
    %217 = vector.broadcast %215 : vector<8x1xf32> to vector<8x256xf32>
    %218 = vector.broadcast %216 : vector<1x256xf32> to vector<8x256xf32>
    %219 = arith.mulf %217, %218 : vector<8x256xf32>
    %220 = arith.addf %214, %219 : vector<8x256xf32>
    %c239_i32 = arith.constant 239 : i32
    %221 = tpu.dynamic_rotate %1 by %c239_i32 dim 1 : vector<4x256xf32>, i32 -> vector<4x256xf32>
    %c8_49 = arith.constant 8 : index
    %c0_50 = arith.constant 0 : index
    %222 = vector.load %arg4[%c8_49, %c0_50] : memref<9x256xf32, #tpu.memory_space<vmem>>, vector<1x256xf32>
    %223 = vector.broadcast %222 : vector<1x256xf32> to vector<4x256xf32>
    %224 = arith.mulf %221, %223 : vector<4x256xf32>
    %c0_51 = arith.constant 0 : index
    %c32 = arith.constant 32 : index
    %225 = vector.load %arg2[%c0_51, %c32] : memref<8x36xf32, #tpu.memory_space<vmem>>, vector<8x1xf32>
    %226 = vector.extract_strided_slice %224 {offsets = [0, 0], sizes = [1, 256], strides = [1, 1]} : vector<4x256xf32> to vector<1x256xf32>
    %227 = vector.broadcast %225 : vector<8x1xf32> to vector<8x256xf32>
    %228 = vector.broadcast %226 : vector<1x256xf32> to vector<8x256xf32>
    %229 = arith.mulf %227, %228 : vector<8x256xf32>
    %230 = arith.addf %220, %229 : vector<8x256xf32>
    %c0_52 = arith.constant 0 : index
    %c33 = arith.constant 33 : index
    %231 = vector.load %arg2[%c0_52, %c33] : memref<8x36xf32, #tpu.memory_space<vmem>>, vector<8x1xf32>
    %232 = vector.extract_strided_slice %224 {offsets = [1, 0], sizes = [1, 256], strides = [1, 1]} : vector<4x256xf32> to vector<1x256xf32>
    %233 = vector.broadcast %231 : vector<8x1xf32> to vector<8x256xf32>
    %234 = vector.broadcast %232 : vector<1x256xf32> to vector<8x256xf32>
    %235 = arith.mulf %233, %234 : vector<8x256xf32>
    %236 = arith.addf %230, %235 : vector<8x256xf32>
    %c0_53 = arith.constant 0 : index
    %c34 = arith.constant 34 : index
    %237 = vector.load %arg2[%c0_53, %c34] : memref<8x36xf32, #tpu.memory_space<vmem>>, vector<8x1xf32>
    %238 = vector.extract_strided_slice %224 {offsets = [2, 0], sizes = [1, 256], strides = [1, 1]} : vector<4x256xf32> to vector<1x256xf32>
    %239 = vector.broadcast %237 : vector<8x1xf32> to vector<8x256xf32>
    %240 = vector.broadcast %238 : vector<1x256xf32> to vector<8x256xf32>
    %241 = arith.mulf %239, %240 : vector<8x256xf32>
    %242 = arith.addf %236, %241 : vector<8x256xf32>
    %c0_54 = arith.constant 0 : index
    %c35 = arith.constant 35 : index
    %243 = vector.load %arg2[%c0_54, %c35] : memref<8x36xf32, #tpu.memory_space<vmem>>, vector<8x1xf32>
    %244 = vector.extract_strided_slice %224 {offsets = [3, 0], sizes = [1, 256], strides = [1, 1]} : vector<4x256xf32> to vector<1x256xf32>
    %245 = vector.broadcast %243 : vector<8x1xf32> to vector<8x256xf32>
    %246 = vector.broadcast %244 : vector<1x256xf32> to vector<8x256xf32>
    %247 = arith.mulf %245, %246 : vector<8x256xf32>
    %248 = arith.addf %242, %247 : vector<8x256xf32>
    %c0_55 = arith.constant 0 : index
    %c0_56 = arith.constant 0 : index
    %249 = vector.load %arg3[%c0_55, %c0_56] : memref<8x1xf32, #tpu.memory_space<vmem>>, vector<8x1xf32>
    %250 = vector.broadcast %249 : vector<8x1xf32> to vector<8x256xf32>
    %251 = arith.addf %248, %250 : vector<8x256xf32>
    %cst = arith.constant 0.000000e+00 : f32
    %252 = vector.broadcast %cst : f32 to vector<8x256xf32>
    %253 = arith.cmpf ogt, %251, %252 : vector<8x256xf32>
    %cst_57 = arith.constant 0.00999999977 : f32
    %254 = vector.broadcast %cst_57 : f32 to vector<8x256xf32>
    %255 = arith.mulf %254, %251 : vector<8x256xf32>
    %256 = arith.select %253, %251, %255 : vector<8x256xi1>, vector<8x256xf32>
    %c0_58 = arith.constant 0 : index
    %c0_59 = arith.constant 0 : index
    %c0_60 = arith.constant 0 : index
    %257 = vector.load %arg5[%c0_58, %c0_59, %c0_60] : memref<1x8x256xf32, #tpu.memory_space<vmem>>, vector<1x8x256xf32>
    %258 = vector.shape_cast %257 : vector<1x8x256xf32> to vector<8x256xf32>
    %259 = vector.shape_cast %256 : vector<8x256xf32> to vector<1x8x256xf32>
    tpu.vector_store %arg5[%c0_58, %c0_59, %c0_60], %259 {strides = array<i32>} : memref<1x8x256xf32, #tpu.memory_space<vmem>>, vector<1x8x256xf32>,
    return
  }
  func.func @transform_0(%arg0: i32) -> (i32, i32, i32) {
    %c0_i32 = arith.constant 0 : i32
    %c0_i32_0 = arith.constant 0 : i32
    %c0_i32_1 = arith.constant 0 : i32
    return %arg0, %c0_i32, %c0_i32_0 : i32, i32, i32
  }
  func.func @transform_1(%arg0: i32) -> (i32, i32) {
    %c0_i32 = arith.constant 0 : i32
    %c0_i32_0 = arith.constant 0 : i32
    %c0_i32_1 = arith.constant 0 : i32
    return %c0_i32, %c0_i32_0 : i32, i32
  }
  func.func @transform_2(%arg0: i32) -> (i32, i32) {
    %c0_i32 = arith.constant 0 : i32
    %c0_i32_0 = arith.constant 0 : i32
    %c0_i32_1 = arith.constant 0 : i32
    return %c0_i32, %c0_i32_0 : i32, i32
  }
  func.func @transform_3(%arg0: i32) -> (i32, i32) {
    %c0_i32 = arith.constant 0 : i32
    %c0_i32_0 = arith.constant 0 : i32
    %c0_i32_1 = arith.constant 0 : i32
    return %c0_i32, %c0_i32_0 : i32, i32
  }
  func.func @transform_4(%arg0: i32) -> (i32, i32, i32) {
    %c0_i32 = arith.constant 0 : i32
    %c0_i32_0 = arith.constant 0 : i32
    %c0_i32_1 = arith.constant 0 : i32
    return %arg0, %c0_i32, %c0_i32_0 : i32, i32, i32
  }
}

</mosaic_0001>

<bundles_post_ra>
// kernel: conv_bn_relu_pallas.1
= control target key start
LH: loop header
LB: loop body
LE: loop exit
PB: predicated region body
PF: predicated region fallthrough
CT: control target
= control target key end

     0   :  { %s1268_s15 = smov 0   ;;  %s1512_s0 = inlined_call_operand.vmem [shape: f32[2,4,256], index: 0, kind: input, shape index: {}]   ;;  %s1513_s1 = inlined_call_operand.vmem [shape: f32[8,36], index: 1, kind: input, shape index: {}]   ;;  %s1514_s2 = inlined_call_operand.vmem [shape: f32[8,1], index: 2, kind: input, shape index: {}]   ;;  %s1515_s3 = inlined_call_operand.vmem [shape: f32[9,256], index: 3, kind: input, shape index: {}]   ;;  %s1516_s4 = inlined_call_operand.vmem [shape: f32[2,8,256], index: 4, kind: output, shape index: {}]  }
   0x1 LB: > { %s1080_s16 = sadd.s32 4294967295, %s1197_s15   ;;  %p1084_p0 = scmp.ge.s32.totalorder %s1197_s15, 1  ;;  %s1197_s15 = sphi %s1268_s15, %s14_s15  }
   0x2   : > { %p162_p1 = scmp.lt.s32.totalorder %s1197_s15, 3 }
   0x4   : > { %p163_p2 = pnand %p1084_p0, %p162_p1 }
   0x5   : > { %p188_p3 = scmp.lt.s32.totalorder (!%p163_p2), %s1080_s16, 1  ;;  %s1202_s23 = smov (!%p163_p2), 17  }
   0x6   : > { %166 = sbr.rel (%p163_p2) target bundleno = 287 (0x11f), region = 36  ;;  %s1204_s24 = smov (!%p163_p2), 16  }
   0x7   : > { %s1208_s25 = smov (!%p163_p2), 15   ;;  %s1216_s26 = smov (!%p163_p2), 1  }
   0x8   : > { %s1219_s27 = smov (!%p163_p2), 127   ;;  %s1222_s28 = smov (!%p163_p2), 113  }
   0x9   : > { %s1237_s29 = smov (!%p163_p2), 112   ;;  %s1240_s30 = smov (!%p163_p2), 111  }
   0xb   : > { %v1279_v0 = vld [vmem:[%s1513_s1] sm:$0xff]  ;;  %v1199_v1 = vmov 0   ;;  %s1518_s16 = smov (!%p188_p3, %s1080_s16), 1  ;;  %v1200_v2 = vmov 2   ;;  %v1201_v3 = vmov 1   ;;  %v1203_v6 = vmov 3  }
   0xc   : > { %1152 = vset.pattern.permute.xlu1 %v1199_v1  ;;  %1154 = vset.pattern.permute.xlu0 %v1200_v2  ;;  %s1098_s19 = sshll.u32 %s1518_s16, 3  ;;  %v1205_v7 = vmov 4   ;;  %v1206_v8 = vmov 5   ;;  %v1207_v9 = vmov 6   ;;  %v1209_v10 = vmov 8   ;;  %v1009_v56 = vld [vmem:[%s1514_s2] sm:$0xff] }
   0xd   : > { %228 = vperm.xlu1 %1152, %v1279_v0   ;;  %s192_s22 = scalar_lea.vmem %s1512_s0, %s1098_s19  ;;  %v1210_v11 = vmov 7   ;;  %v1211_v12 = vmov 9   ;;  %v1212_v13 = vmov 11   ;;  %v1213_v14 = vmov 12  }
   0xe   : > { %v1289_v4 = vld [vmem:[%s192_s22] sm:$0xff]  ;;  %v1214_v15 = vmov 10   ;;  %v1215_v16 = vmov 15   ;;  %v1217_v17 = vmov 13   ;;  %v1218_v18 = vmov 18  }
   0xf   : > { %202 = vrot.lane.b32.xlu0 %v1289_v4, %s1202_s23  ;;  %v1295_v5 = vcombine.high %v1289_v4, %v1289_v4  ;;  %v1220_v19 = vmov 21   ;;  %v1221_v20 = vmov 14   ;;  %v1223_v21 = vmov 16   ;;  %v211_v47 = vld [vmem:[%s1515_s3] ss:$8 sm:$0x3] }
  0x10   : > { %v1224_v22 = vmov 24   ;;  %v1225_v23 = vmov 17   ;;  %v1226_v24 = vmov 27   ;;  %v1227_v25 = vmov 19  }
  0x11   : > { %1153 = vset.pattern.permute.xlu1 %v1201_v3  ;;  %v1228_v26 = vmov 28   ;;  %v1229_v27 = vmov 20   ;;  %v1230_v28 = vmov 31   ;;  %v1231_v29 = vmov 32  }
  0x12   : > { %242 = vperm.xlu1 %1153, %v1279_v0   ;;  %v1232_v30 = vmov 22   ;;  %v1233_v31 = vmov 35   ;;  %v1234_v32 = vmov 23   ;;  %v1235_v33 = vmov 25  }
  0x13   : > { %204 = vrot.lane.b32.xlu0 %v1295_v5, %s1202_s23  ;;  %v1236_v34 = vmov 26   ;;  %v1238_v35 = vmov 29   ;;  %v1239_v36 = vmov 30   ;;  %v206_v38 = vlaneseq  ;;  %v1089_v60 = vld [vmem:[%s1515_s3 + $0x1] ss:$8 sm:$0x3] }
  0x14   : > { %v1241_v39 = vmov 33   ;;  %v1242_v52 = vmov 34  }
  0x15   : > { %v1346_v42 = vshrl.u32 %v206_v38, 7  ;;  %v1349_v43 = vand.u32 127, %v206_v38 }
  0x16   : > { %1155 = vset.pattern.permute.xlu1 %v1203_v6 }
  0x17   : > { %274 = vperm.xlu1 %1155, %v1279_v0   ;;  %258 = vperm.xlu0 %1154, %v1279_v0   ;;  %v1352_v44 = vsub.s32 0, %v1346_v42  ;;  %v1355_v45 = vsub.s32 1, %v1346_v42  ;;  %vm208_vm0 = vcmp.lt.s32.totalorder %v1349_v43, 17  ;;  %v1373_v61 = vsub.s32 2, %v1346_v42 }
  0x18   : > { %vm293_vm1 = vcmp.lt.s32.totalorder %v1349_v43, 16  ;;  %vm381_vm2 = vcmp.lt.s32.totalorder %v1349_v43, 15  ;;  %vm469_vm3 = vcmp.lt.s32.totalorder %v1349_v43, 1  ;;  %vm661_vm4 = vcmp.lt.s32.totalorder %v1349_v43, 127 }
  0x19   : > { %v216_v49 = vrot.slane %v211_v47, %v1352_v44  ;;  %v220_v50 = vrot.slane %v211_v47, %v1355_v45  ;;  %vm749_vm5 = vcmp.lt.s32.totalorder %v1349_v43, 113  ;;  %vm837_vm6 = vcmp.lt.s32.totalorder %v1349_v43, 112 }
  0x1a   : > { %vm925_vm7 = vcmp.lt.s32.totalorder %v1349_v43, 111 }
  0x1b   : > { %289 = vrot.lane.b32.xlu1 %v1289_v4, %s1204_s24  ;;  %291 = vrot.lane.b32.xlu0 %v1295_v5, %s1204_s24 }
  0x1c   : > { %1156 = vset.pattern.permute.xlu1 %v1205_v7  ;;  %1157 = vset.pattern.permute.xlu0 %v1206_v8 }
  0x1f   : > { %314 = vperm.xlu1 %1156, %v1279_v0   ;;  %330 = vperm.xlu0 %1157, %v1279_v0  }
  0x23   : > { %1158 = vset.pattern.permute.xlu1 %v1207_v9  ;;  %377 = vrot.lane.b32.xlu0 %v1289_v4, %s1208_s25 }
  0x24   : > { %346 = vperm.xlu1 %1158, %v1279_v0   ;;  %1160 = vset.pattern.permute.xlu0 %v1209_v10 }
  0x27   : > { %402 = vperm.xlu0 %1160, %v1279_v0  }
  0x28   : > { %1159 = vset.pattern.permute.xlu1 %v1210_v11 }
  0x29   : > { %362 = vperm.xlu1 %1159, %v1279_v0  }
  0x2b   : > { %1163 = vset.pattern.permute.xlu0 %v1212_v13  ;;  %v1385_v13 = vsub.s32 3, %v1346_v42 }
  0x2c   : > { %450 = vperm.xlu0 %1163, %v1279_v0  }
  0x2d   : > { %379 = vrot.lane.b32.xlu1 %v1295_v5, %s1208_s25  ;;  %s1099_s25 = sshll.u32 %s1518_s16, 4 }
  0x2e   : > { %1161 = vset.pattern.permute.xlu1 %v1211_v12 }
  0x30   : > { %1164 = vset.pattern.permute.xlu0 %v1213_v14 }
  0x31   : > { %418 = vperm.xlu1 %1161, %v1279_v0   ;;  %490 = vperm.xlu0 %1164, %v1279_v0  }
  0x35   : > { %1162 = vset.pattern.permute.xlu1 %v1214_v15  ;;  %1167 = vset.pattern.permute.xlu0 %v1215_v16 }
  0x36   : > { %434 = vperm.xlu1 %1162, %v1279_v0   ;;  %538 = vperm.xlu0 %1167, %v1279_v0  }
  0x3a   : > { %465 = vrot.lane.b32.xlu1 %v1289_v4, %s1216_s26  ;;  %1170 = vset.pattern.permute.xlu0 %v1218_v18 }
  0x3b   : > { %1165 = vset.pattern.permute.xlu1 %v1217_v17  ;;  %606 = vperm.xlu0 %1170, %v1279_v0  }
  0x3e   : > { %467 = vrot.lane.b32.xlu1 %v1295_v5, %s1216_s26 }
  0x3f   : > { %659 = vrot.lane.b32.xlu0 %v1295_v5, %s1219_s27 }
  0x40   : > { %1173 = vset.pattern.permute.xlu0 %v1220_v19 }
  0x42   : > { %506 = vperm.xlu1 %1165, %v1279_v0  }
  0x43   : > { %698 = vperm.xlu0 %1173, %v1279_v0  }
  0x46   : > { %1166 = vset.pattern.permute.xlu1 %v1221_v20 }
  0x47   : > { %522 = vperm.xlu1 %1166, %v1279_v0   ;;  %745 = vrot.lane.b32.xlu0 %v1289_v4, %s1222_s28 }
  0x48   : > { %1176 = vset.pattern.permute.xlu0 %v1224_v22 }
  0x4b   : > { %1168 = vset.pattern.permute.xlu1 %v1223_v21  ;;  %770 = vperm.xlu0 %1176, %v1279_v0  }
  0x4c   : > { %554 = vperm.xlu1 %1168, %v1279_v0  }
  0x4f   : > { %1179 = vset.pattern.permute.xlu0 %v1226_v24 }
  0x50   : > { %1169 = vset.pattern.permute.xlu1 %v1225_v23  ;;  %818 = vperm.xlu0 %1179, %v1279_v0  }
  0x51   : > { %580 = vperm.xlu1 %1169, %v1279_v0  }
  0x54   : > { %1180 = vset.pattern.permute.xlu0 %v1228_v26 }
  0x55   : > { %1171 = vset.pattern.permute.xlu1 %v1227_v25  ;;  %858 = vperm.xlu0 %1180, %v1279_v0  }
  0x56   : > { %632 = vperm.xlu1 %1171, %v1279_v0  }
  0x59   : > { %1183 = vset.pattern.permute.xlu0 %v1230_v28 }
  0x5a   : > { %657 = vrot.lane.b32.xlu1 %v1289_v4, %s1219_s27  ;;  %906 = vperm.xlu0 %1183, %v1279_v0  }
  0x5b   : > { %1172 = vset.pattern.permute.xlu1 %v1229_v27 }
  0x5e   : > { %682 = vperm.xlu1 %1172, %v1279_v0   ;;  %1184 = vset.pattern.permute.xlu0 %v1231_v29 }
  0x5f   : > { %946 = vperm.xlu0 %1184, %v1279_v0  }
  0x62   : > { %1174 = vset.pattern.permute.xlu1 %v1232_v30 }
  0x63   : > { %714 = vperm.xlu1 %1174, %v1279_v0   ;;  %1187 = vset.pattern.permute.xlu0 %v1233_v31  ;;  %v1090_v31 = vld [vmem:[%s1515_s3 + $0x2] ss:$8 sm:$0x3] }
  0x64   : > { %994 = vperm.xlu0 %1187, %v1279_v0  }
  0x67   : > { %1175 = vset.pattern.permute.xlu1 %v1234_v32 }
  0x68   : > { %730 = vperm.xlu1 %1175, %v1279_v0   ;;  %1189 = vset.pattern.permute.xlu0 %v1199_v1 }
  0x6c   : > { %747 = vrot.lane.b32.xlu1 %v1295_v5, %s1222_s28  ;;  %s197_s28 = scalar_lea.vmem %s1516_s4, %s1099_s25 }
  0x6d   : > { %1177 = vset.pattern.permute.xlu1 %v1235_v33 }
  0x70   : > { %786 = vperm.xlu1 %1177, %v1279_v0  }
  0x74   : > { %1178 = vset.pattern.permute.xlu1 %v1236_v34 }
  0x75   : > { %802 = vperm.xlu1 %1178, %v1279_v0  }
  0x79   : > { %833 = vrot.lane.b32.xlu1 %v1289_v4, %s1237_s29 }
  0x7a   : > { %1181 = vset.pattern.permute.xlu1 %v1238_v35 }
  0x7d   : > { %835 = vrot.lane.b32.xlu1 %v1295_v5, %s1237_s29 }
  0x81   : > { %874 = vperm.xlu1 %1181, %v1279_v0   ;;  %v203_v40 = vpop.permute.xlu0 %202 }
  0x85   : > { %1182 = vset.pattern.permute.xlu1 %v1239_v36  ;;  %v205_v48 = vpop.permute.xlu0 %204  ;;  %v390_v36 = vrot.slane %v1090_v31, %v1352_v44 }
  0x86   : > { %890 = vperm.xlu1 %1182, %v1279_v0   ;;  %v209_v53 = vsel %vm208_vm0, %v203_v40, %v205_v48  ;;  %v210_v54 = vsel %vm208_vm0, %v205_v48, %v203_v40 }
  0x87   : > { %v223_v57 = vmul.f32 %v216_v49, %v210_v54  ;;  %v224_v58 = vmul.f32 %v220_v50, %v209_v53 }
  0x88   : > { %v229_v37 = vpop.permute.xlu1 %228 }
  0x89   : > { %v234_v63 = vrot.slane %v223_v57, %v1352_v44  ;;  %v248_v2 = vrot.slane %v223_v57, %v1355_v45  ;;  %v252_v3 = vrot.slane %v224_v58, %v1355_v45  ;;  %v264_v9 = vrot.slane %v223_v57, %v1373_v61 }
  0x8a   : > { %921 = vrot.lane.b32.xlu1 %v1289_v4, %s1240_s30  ;;  %v268_v10 = vrot.slane %v224_v58, %v1373_v61  ;;  %v280_v21 = vrot.slane %v223_v57, %v1385_v13  ;;  %v284_v22 = vrot.slane %v224_v58, %v1385_v13 }
  0x8b   : > { %1185 = vset.pattern.permute.xlu1 %v1241_v39  ;;  %v239_v11 = vmul.f32 %v234_v63, %v229_v37 }
  0x8d   : > { %v243_v41 = vpop.permute.xlu1 %242 }
  0x8e   : > { %923 = vrot.lane.b32.xlu1 %v1295_v5, %s1240_s30  ;;  %v306_v5 = vrot.slane %v1089_v60, %v1355_v45  ;;  %v253_v14 = vmul.f32 %v248_v2, %v243_v41  ;;  %v254_v15 = vmul.f32 %v252_v3, %v243_v41 }
  0x90   : > { %v255_v23 = vadd.f32 %v253_v14, %v239_v11  ;;  %v1091_v11 = vld [vmem:[%s1515_s3 + $0x3] ss:$8 sm:$0x3] }
  0x92   : > { %v275_v46 = vpop.permute.xlu1 %274  ;;  %962 = vperm.xlu1 %1185, %v1279_v0   ;;  %v259_v55 = vpop.permute.xlu0 %258 }
  0x93   : > { %v269_v19 = vmul.f32 %v264_v9, %v259_v55  ;;  %v270_v20 = vmul.f32 %v268_v10, %v259_v55  ;;  %v285_v32 = vmul.f32 %v280_v21, %v275_v46  ;;  %v286_v33 = vmul.f32 %v284_v22, %v275_v46 }
  0x95   : > { %v271_v28 = vadd.f32 %v269_v19, %v255_v23 }
  0x96   : > { %v290_v51 = vpop.permute.xlu1 %289  ;;  %1186 = vset.pattern.permute.xlu1 %v1242_v52  ;;  %v292_v62 = vpop.permute.xlu0 %291 }
  0x97   : > { %978 = vperm.xlu1 %1186, %v1279_v0   ;;  %v238_v0 = vrot.slane %v224_v58, %v1352_v44  ;;  %v294_v7 = vsel %vm293_vm1, %v290_v51, %v292_v62  ;;  %v295_v8 = vsel %vm293_vm1, %v292_v62, %v290_v51  ;;  %v287_v39 = vadd.f32 %v285_v32, %v271_v28 }
  0x98   : > { %v310_v17 = vmul.f32 %v306_v5, %v294_v7 }
  0x99   : > { %v240_v12 = vmul.f32 %v238_v0, %v229_v37  ;;  %v394_v37 = vrot.slane %v1090_v31, %v1355_v45 }
  0x9a   : > { %v315_v59 = vpop.permute.xlu1 %314  ;;  %v324_v26 = vrot.slane %v310_v17, %v1352_v44  ;;  %v331_v30 = vpop.permute.xlu0 %330  ;;  %v340_v47 = vrot.slane %v310_v17, %v1355_v45  ;;  %v356_v53 = vrot.slane %v310_v17, %v1373_v61  ;;  %v372_v63 = vrot.slane %v310_v17, %v1385_v13 }
  0x9b   : > { %1188 = vset.pattern.permute.xlu1 %v1199_v1  ;;  %v302_v1 = vrot.slane %v1089_v60, %v1352_v44  ;;  %v256_v24 = vadd.f32 %v254_v15, %v240_v12  ;;  %v482_v17 = vrot.slane %v1091_v11, %v1355_v45 }
  0x9c   : > { %1012 = vperm.xlu1 %1188, %v1009_v56   ;;  %v326_v35 = vmul.f32 %v324_v26, %v315_v59  ;;  %v342_v55 = vmul.f32 %v340_v47, %v331_v30 }
  0x9d   : > { %v309_v16 = vmul.f32 %v302_v1, %v295_v8  ;;  %v272_v29 = vadd.f32 %v270_v20, %v256_v24 }
  0x9e   : > { %v378_v48 = vpop.permute.xlu0 %377 }
  0x9f   : > { %v347_v6 = vpop.permute.xlu1 %346  ;;  %v320_v25 = vrot.slane %v309_v16, %v1352_v44  ;;  %v288_v40 = vadd.f32 %v286_v33, %v272_v29  ;;  %v336_v41 = vrot.slane %v309_v16, %v1355_v45  ;;  %v352_v46 = vrot.slane %v309_v16, %v1373_v61 }
  0xa0   : > { %v368_v62 = vrot.slane %v309_v16, %v1385_v13  ;;  %v358_v2 = vmul.f32 %v356_v53, %v347_v6 }
  0xa1   : > { %v325_v34 = vmul.f32 %v320_v25, %v315_v59  ;;  %v328_v52 = vadd.f32 %v326_v35, %v288_v40  ;;  %v341_v54 = vmul.f32 %v336_v41, %v331_v30  ;;  %v357_v0 = vmul.f32 %v352_v46, %v347_v6 }
  0xa2   : > { %v403_v12 = vpop.permute.xlu0 %402  ;;  %v478_v6 = vrot.slane %v1091_v11, %v1352_v44 }
  0xa3   : > { %v327_v51 = vadd.f32 %v325_v34, %v287_v39  ;;  %v344_v60 = vadd.f32 %v342_v55, %v328_v52 }
  0xa4   : > { %v363_v18 = vpop.permute.xlu1 %362 }
  0xa5   : > { %v343_v59 = vadd.f32 %v341_v54, %v327_v51  ;;  %v360_v8 = vadd.f32 %v358_v2, %v344_v60  ;;  %v373_v9 = vmul.f32 %v368_v62, %v363_v18  ;;  %v374_v10 = vmul.f32 %v372_v63, %v363_v18 }
  0xa6   : > { %v589_v63 = vsub.s32 5, %v1346_v42 }
  0xa7   : > { %v359_v7 = vadd.f32 %v357_v0, %v343_v59  ;;  %v376_v20 = vadd.f32 %v374_v10, %v360_v8  ;;  %v560_v8 = vrot.slane %v1289_v4, %v1352_v44 }
  0xa8   : > { %v380_v27 = vpop.permute.xlu1 %379 }
  0xa9   : > { %v382_v49 = vsel %vm381_vm2, %v378_v48, %v380_v27  ;;  %v383_v50 = vsel %vm381_vm2, %v380_v27, %v378_v48  ;;  %v375_v19 = vadd.f32 %v373_v9, %v359_v7 }
  0xaa   : > { %v397_v56 = vmul.f32 %v390_v36, %v383_v50  ;;  %v398_v57 = vmul.f32 %v394_v37, %v382_v49  ;;  %v451_v37 = vpop.permute.xlu0 %450 }
  0xac   : > { %v419_v38 = vpop.permute.xlu1 %418  ;;  %v408_v3 = vrot.slane %v397_v56, %v1352_v44  ;;  %v412_v1 = vrot.slane %v398_v57, %v1352_v44  ;;  %v424_v21 = vrot.slane %v397_v56, %v1355_v45  ;;  %v428_v18 = vrot.slane %v398_v57, %v1355_v45 }
  0xad   : > { %v440_v27 = vrot.slane %v397_v56, %v1373_v61  ;;  %v444_v28 = vrot.slane %v398_v57, %v1373_v61  ;;  %v456_v40 = vrot.slane %v397_v56, %v1385_v13  ;;  %v460_v41 = vrot.slane %v398_v57, %v1385_v13 }
  0xae   : > { %v413_v14 = vmul.f32 %v408_v3, %v403_v12  ;;  %v414_v15 = vmul.f32 %v412_v1, %v403_v12  ;;  %v429_v29 = vmul.f32 %v424_v21, %v419_v38  ;;  %v430_v30 = vmul.f32 %v428_v18, %v419_v38  ;;  %v491_v51 = vpop.permute.xlu0 %490 }
  0xaf   : > { %v461_v38 = vmul.f32 %v456_v40, %v451_v37  ;;  %v462_v52 = vmul.f32 %v460_v41, %v451_v37  ;;  %v563_v57 = vsub.s32 4, %v1346_v42 }
  0xb0   : > { %v415_v24 = vadd.f32 %v413_v14, %v375_v19  ;;  %v416_v25 = vadd.f32 %v414_v15, %v376_v20  ;;  %v586_v15 = vrot.slane %v1289_v4, %v1355_v45  ;;  %v615_v19 = vsub.s32 6, %v1346_v42 }
  0xb1   : > { %v435_v58 = vpop.permute.xlu1 %434  ;;  %v564_v9 = vrot.slane %v1289_v4, %v563_v57 }
  0xb2   : > { %v431_v33 = vadd.f32 %v429_v29, %v415_v24  ;;  %v432_v34 = vadd.f32 %v430_v30, %v416_v25  ;;  %v445_v35 = vmul.f32 %v440_v27, %v435_v58  ;;  %v446_v36 = vmul.f32 %v444_v28, %v435_v58  ;;  %v539_v1 = vpop.permute.xlu0 %538  ;;  %v1092_v25 = vld [vmem:[%s1515_s3 + $0x5] ss:$8 sm:$0x3] }
  0xb3   : > { %v574_v24 = vrot.slane %v564_v9, %v1352_v44  ;;  %v612_v28 = vrot.slane %v1289_v4, %v1373_v61  ;;  %v641_v29 = vsub.s32 7, %v1346_v42 }
  0xb4   : > { %v447_v49 = vadd.f32 %v445_v35, %v431_v33  ;;  %v448_v50 = vadd.f32 %v446_v36, %v432_v34  ;;  %v670_v35 = vrot.slane %v1092_v25, %v1352_v44  ;;  %v674_v36 = vrot.slane %v1092_v25, %v1355_v45 }
  0xb5   : > { %v466_v5 = vpop.permute.xlu1 %465  ;;  %v642_v42 = vrot.slane %v1289_v4, %v641_v29 }
  0xb6   : > { %v463_v55 = vadd.f32 %v461_v38, %v447_v49  ;;  %v464_v58 = vadd.f32 %v462_v52, %v448_v50  ;;  %v607_v20 = vpop.permute.xlu0 %606  ;;  %v622_v38 = vrot.slane %v612_v28, %v1373_v61 }
  0xb9   : > { %v468_v16 = vpop.permute.xlu1 %467 }
  0xba   : > { %v470_v22 = vsel %vm469_vm3, %v466_v5, %v468_v16  ;;  %v471_v23 = vsel %vm469_vm3, %v468_v16, %v466_v5  ;;  %v590_v16 = vrot.slane %v1289_v4, %v589_v63  ;;  %v660_v34 = vpop.permute.xlu0 %659 }
  0xbb   : > { %v485_v31 = vmul.f32 %v478_v6, %v471_v23  ;;  %v486_v32 = vmul.f32 %v482_v17, %v470_v22  ;;  %v570_v23 = vrot.slane %v560_v8, %v1352_v44  ;;  %v1093_v8 = vld [vmem:[%s1515_s3 + $0x6] ss:$8 sm:$0x3] }
  0xbc   : > { %v600_v27 = vrot.slane %v590_v16, %v1355_v45 }
  0xbd   : > { %v507_v26 = vpop.permute.xlu1 %506  ;;  %v496_v47 = vrot.slane %v485_v31, %v1352_v44  ;;  %v500_v48 = vrot.slane %v486_v32, %v1352_v44  ;;  %v512_v59 = vrot.slane %v485_v31, %v1355_v45  ;;  %v516_v56 = vrot.slane %v486_v32, %v1355_v45 }
  0xbe   : > { %v528_v5 = vrot.slane %v485_v31, %v1373_v61  ;;  %v532_v7 = vrot.slane %v486_v32, %v1373_v61  ;;  %v544_v6 = vrot.slane %v485_v31, %v1385_v13  ;;  %v548_v17 = vrot.slane %v486_v32, %v1385_v13 }
  0xbf   : > { %v501_v46 = vmul.f32 %v496_v47, %v491_v51  ;;  %v502_v53 = vmul.f32 %v500_v48, %v491_v51  ;;  %v517_v2 = vmul.f32 %v512_v59, %v507_v26  ;;  %v518_v3 = vmul.f32 %v516_v56, %v507_v26 }
  0xc0   : > { %v596_v26 = vrot.slane %v586_v15, %v1355_v45  ;;  %v549_v30 = vmul.f32 %v544_v6, %v539_v1  ;;  %v550_v31 = vmul.f32 %v548_v17, %v539_v1  ;;  %v616_v32 = vrot.slane %v1289_v4, %v615_v19 }
  0xc1   : > { %v503_v60 = vadd.f32 %v501_v46, %v463_v55  ;;  %v504_v62 = vadd.f32 %v502_v53, %v464_v58  ;;  %v638_v47 = vrot.slane %v1289_v4, %v1385_v13  ;;  %v652_v56 = vrot.slane %v642_v42, %v1385_v13 }
  0xc2   : > { %v523_v39 = vpop.permute.xlu1 %522  ;;  %v626_v52 = vrot.slane %v616_v32, %v1373_v61  ;;  %v627_v4 = vmul.f32 %v622_v38, %v607_v20  ;;  %v762_v15 = vrot.slane %v1093_v8, %v1355_v45 }
  0xc3   : > { %v519_v10 = vadd.f32 %v517_v2, %v503_v60  ;;  %v520_v11 = vadd.f32 %v518_v3, %v504_v62  ;;  %v533_v12 = vmul.f32 %v528_v5, %v523_v39  ;;  %v534_v14 = vmul.f32 %v532_v7, %v523_v39 }
  0xc4   : > { %v628_v62 = vmul.f32 %v626_v52, %v607_v20 }
  0xc5   : > { %v535_v18 = vadd.f32 %v533_v12, %v519_v10  ;;  %v536_v22 = vadd.f32 %v534_v14, %v520_v11  ;;  %v699_v11 = vpop.permute.xlu0 %698  ;;  %v758_v14 = vrot.slane %v1093_v8, %v1352_v44 }
  0xc7   : > { %v555_v54 = vpop.permute.xlu1 %554  ;;  %v551_v37 = vadd.f32 %v549_v30, %v535_v18  ;;  %v552_v39 = vadd.f32 %v550_v31, %v536_v22 }
  0xc8   : > { %v575_v40 = vmul.f32 %v570_v23, %v555_v54  ;;  %v576_v41 = vmul.f32 %v574_v24, %v555_v54  ;;  %v648_v54 = vrot.slane %v638_v47, %v1385_v13 }
  0xc9   : > { %v746_v18 = vpop.permute.xlu0 %745 }
  0xca   : > { %v577_v53 = vadd.f32 %v575_v40, %v551_v37  ;;  %v578_v55 = vadd.f32 %v576_v41, %v552_v39 }
  0xcc   : > { %v581_v0 = vpop.permute.xlu1 %580 }
  0xcd   : > { %v601_v50 = vmul.f32 %v596_v26, %v581_v0  ;;  %v602_v51 = vmul.f32 %v600_v27, %v581_v0  ;;  %v771_v42 = vpop.permute.xlu0 %770 }
  0xcf   : > { %v603_v57 = vadd.f32 %v601_v50, %v577_v53  ;;  %v604_v60 = vadd.f32 %v602_v51, %v578_v55 }
  0xd1   : > { %v633_v21 = vpop.permute.xlu1 %632  ;;  %v629_v3 = vadd.f32 %v627_v4, %v603_v57  ;;  %v630_v1 = vadd.f32 %v628_v62, %v604_v60 }
  0xd2   : > { %v653_v5 = vmul.f32 %v648_v54, %v633_v21  ;;  %v654_v7 = vmul.f32 %v652_v56, %v633_v21 }
  0xd4   : > { %v655_v16 = vadd.f32 %v653_v5, %v629_v3  ;;  %v656_v6 = vadd.f32 %v654_v7, %v630_v1 }
  0xd5   : > { %v658_v33 = vpop.permute.xlu1 %657 }
  0xd6   : > { %v662_v48 = vsel %vm661_vm4, %v658_v33, %v660_v34  ;;  %v663_v49 = vsel %vm661_vm4, %v660_v34, %v658_v33 }
  0xd7   : > { %v677_v58 = vmul.f32 %v670_v35, %v662_v48  ;;  %v678_v59 = vmul.f32 %v674_v36, %v663_v49 }
  0xd9   : > { %v683_v46 = vpop.permute.xlu1 %682  ;;  %v688_v0 = vrot.slane %v677_v58, %v1352_v44  ;;  %v692_v2 = vrot.slane %v678_v59, %v1352_v44  ;;  %v704_v17 = vrot.slane %v677_v58, %v1355_v45  ;;  %v708_v19 = vrot.slane %v678_v59, %v1355_v45 }
  0xda   : > { %v720_v29 = vrot.slane %v677_v58, %v1373_v61  ;;  %v724_v30 = vrot.slane %v678_v59, %v1373_v61  ;;  %v736_v33 = vrot.slane %v677_v58, %v1385_v13  ;;  %v740_v34 = vrot.slane %v678_v59, %v1385_v13  ;;  %v1094_v58 = vld [vmem:[%s1515_s3 + $0x7] ss:$8 sm:$0x3] }
  0xdb   : > { %v693_v9 = vmul.f32 %v688_v0, %v683_v46  ;;  %v694_v10 = vmul.f32 %v692_v2, %v683_v46  ;;  %v709_v25 = vmul.f32 %v704_v17, %v699_v11  ;;  %v710_v26 = vmul.f32 %v708_v19, %v699_v11 }
  0xdc   : > { %v846_v4 = vrot.slane %v1094_v58, %v1352_v44  ;;  %v850_v62 = vrot.slane %v1094_v58, %v1355_v45 }
  0xdd   : > { %v695_v20 = vadd.f32 %v693_v9, %v655_v16  ;;  %v696_v21 = vadd.f32 %v694_v10, %v656_v6  ;;  %v819_v10 = vpop.permute.xlu0 %818 }
  0xde   : > { %v715_v63 = vpop.permute.xlu1 %714 }
  0xdf   : > { %v711_v31 = vadd.f32 %v709_v25, %v695_v20  ;;  %v712_v32 = vadd.f32 %v710_v26, %v696_v21  ;;  %v725_v36 = vmul.f32 %v720_v29, %v715_v63  ;;  %v726_v37 = vmul.f32 %v724_v30, %v715_v63 }
  0xe1   : > { %v727_v48 = vadd.f32 %v725_v36, %v711_v31  ;;  %v728_v49 = vadd.f32 %v726_v37, %v712_v32  ;;  %v859_v21 = vpop.permute.xlu0 %858  ;;  %v1095_v32 = vld [vmem:[%s1515_s3 + $0x10] ss:$8 sm:$0x3] }
  0xe3   : > { %v731_v12 = vpop.permute.xlu1 %730 }
  0xe4   : > { %v741_v41 = vmul.f32 %v736_v33, %v731_v12  ;;  %v742_v47 = vmul.f32 %v740_v34, %v731_v12 }
  0xe6   : > { %v743_v52 = vadd.f32 %v741_v41, %v727_v48  ;;  %v744_v46 = vadd.f32 %v742_v47, %v728_v49 }
  0xe7   : > { %v748_v22 = vpop.permute.xlu1 %747 }
  0xe8   : > { %v750_v23 = vsel %vm749_vm5, %v746_v18, %v748_v22  ;;  %v751_v24 = vsel %vm749_vm5, %v748_v22, %v746_v18 }
  0xe9   : > { %v765_v27 = vmul.f32 %v758_v14, %v750_v23  ;;  %v766_v28 = vmul.f32 %v762_v15, %v751_v24 }
  0xeb   : > { %v787_v35 = vpop.permute.xlu1 %786  ;;  %v776_v39 = vrot.slane %v765_v27, %v1352_v44  ;;  %v780_v40 = vrot.slane %v766_v28, %v1352_v44  ;;  %v792_v53 = vrot.slane %v765_v27, %v1355_v45  ;;  %v796_v55 = vrot.slane %v766_v28, %v1355_v45 }
  0xec   : > { %v808_v63 = vrot.slane %v765_v27, %v1373_v61  ;;  %v812_v0 = vrot.slane %v766_v28, %v1373_v61  ;;  %v824_v14 = vrot.slane %v765_v27, %v1385_v13  ;;  %v828_v15 = vrot.slane %v766_v28, %v1385_v13 }
  0xed   : > { %v781_v50 = vmul.f32 %v776_v39, %v771_v42  ;;  %v782_v51 = vmul.f32 %v780_v40, %v771_v42  ;;  %v797_v57 = vmul.f32 %v792_v53, %v787_v35  ;;  %v798_v60 = vmul.f32 %v796_v55, %v787_v35 }
  0xee   : > { %v829_v18 = vmul.f32 %v824_v14, %v819_v10  ;;  %v830_v22 = vmul.f32 %v828_v15, %v819_v10  ;;  %v934_v39 = vrot.slane %v1095_v32, %v1352_v44  ;;  %v938_v40 = vrot.slane %v1095_v32, %v1355_v45 }
  0xef   : > { %v783_v59 = vadd.f32 %v781_v50, %v743_v52  ;;  %v784_v54 = vadd.f32 %v782_v51, %v744_v46  ;;  %v907_v51 = vpop.permute.xlu0 %906 }
  0xf0   : > { %v803_v38 = vpop.permute.xlu1 %802 }
  0xf1   : > { %v799_v2 = vadd.f32 %v797_v57, %v783_v59  ;;  %v800_v3 = vadd.f32 %v798_v60, %v784_v54  ;;  %v813_v5 = vmul.f32 %v808_v63, %v803_v38  ;;  %v814_v7 = vmul.f32 %v812_v0, %v803_v38 }
  0xf3   : > { %v815_v19 = vadd.f32 %v813_v5, %v799_v2  ;;  %v816_v20 = vadd.f32 %v814_v7, %v800_v3 }
  0xf4   : > { %v834_v56 = vpop.permute.xlu1 %833 }
  0xf5   : > { %v831_v25 = vadd.f32 %v829_v18, %v815_v19  ;;  %v832_v26 = vadd.f32 %v830_v22, %v816_v20 }
  0xf8   : > { %v836_v1 = vpop.permute.xlu1 %835 }
  0xf9   : > { %v838_v8 = vsel %vm837_vm6, %v834_v56, %v836_v1  ;;  %v839_v9 = vsel %vm837_vm6, %v836_v1, %v834_v56  ;;  %v947_v56 = vpop.permute.xlu0 %946 }
  0xfa   : > { %v853_v11 = vmul.f32 %v846_v4, %v838_v8  ;;  %v854_v12 = vmul.f32 %v850_v62, %v839_v9 }
  0xfc   : > { %v864_v16 = vrot.slane %v853_v11, %v1352_v44  ;;  %v868_v6 = vrot.slane %v854_v12, %v1352_v44  ;;  %v875_v17 = vpop.permute.xlu1 %874  ;;  %v880_v29 = vrot.slane %v853_v11, %v1355_v45  ;;  %v884_v27 = vrot.slane %v854_v12, %v1355_v45 }
  0xfd   : > { %v896_v35 = vrot.slane %v853_v11, %v1373_v61  ;;  %v900_v36 = vrot.slane %v854_v12, %v1373_v61  ;;  %v912_v49 = vrot.slane %v853_v11, %v1385_v13  ;;  %v916_v50 = vrot.slane %v854_v12, %v1385_v13  ;;  %v995_v14 = vpop.permute.xlu0 %994 }
  0xfe   : > { %v869_v23 = vmul.f32 %v864_v16, %v859_v21  ;;  %v870_v24 = vmul.f32 %v868_v6, %v859_v21  ;;  %v885_v33 = vmul.f32 %v880_v29, %v875_v17  ;;  %v886_v34 = vmul.f32 %v884_v27, %v875_v17 }
  0xff   : > { %v917_v59 = vmul.f32 %v912_v49, %v907_v51  ;;  %v918_v54 = vmul.f32 %v916_v50, %v907_v51 }
 0x100   : > { %v871_v28 = vadd.f32 %v869_v23, %v831_v25  ;;  %v872_v31 = vadd.f32 %v870_v24, %v832_v26 }
 0x101   : > { %v891_v30 = vpop.permute.xlu1 %890 }
 0x102   : > { %v887_v41 = vadd.f32 %v885_v33, %v871_v28  ;;  %v888_v47 = vadd.f32 %v886_v34, %v872_v31  ;;  %v901_v42 = vmul.f32 %v896_v35, %v891_v30  ;;  %v902_v48 = vmul.f32 %v900_v36, %v891_v30 }
 0x104   : > { %v903_v53 = vadd.f32 %v901_v42, %v887_v41  ;;  %v904_v55 = vadd.f32 %v902_v48, %v888_v47 }
 0x105   : > { %v922_v37 = vpop.permute.xlu1 %921 }
 0x106   : > { %v919_v0 = vadd.f32 %v917_v59, %v903_v53  ;;  %v920_v2 = vadd.f32 %v918_v54, %v904_v55 }
 0x109   : > { %v924_v38 = vpop.permute.xlu1 %923 }
 0x10a   : > { %v926_v52 = vsel %vm925_vm7, %v922_v37, %v924_v38  ;;  %v927_v46 = vsel %vm925_vm7, %v924_v38, %v922_v37 }
 0x10b   : > { %v941_v58 = vmul.f32 %v934_v39, %v926_v52  ;;  %v942_v43 = vmul.f32 %v938_v40, %v927_v46 }
 0x10d   : > { %v952_v57 = vrot.slane %v941_v58, %v1352_v44  ;;  %v956_v60 = vrot.slane %v942_v43, %v1352_v44  ;;  %v968_v4 = vrot.slane %v941_v58, %v1355_v45  ;;  %v972_v62 = vrot.slane %v942_v43, %v1355_v45  ;;  %v963_v63 = vpop.permute.xlu1 %962 }
 0x10e   : > { %v1000_v5 = vrot.slane %v941_v58, %v1385_v13  ;;  %v1004_v7 = vrot.slane %v942_v43, %v1385_v13  ;;  %v984_v8 = vrot.slane %v941_v58, %v1373_v61  ;;  %v988_v9 = vrot.slane %v942_v43, %v1373_v61 }
 0x10f   : > { %v957_v3 = vmul.f32 %v952_v57, %v947_v56  ;;  %v958_v1 = vmul.f32 %v956_v60, %v947_v56  ;;  %v973_v44 = vmul.f32 %v968_v4, %v963_v63  ;;  %v974_v12 = vmul.f32 %v972_v62, %v963_v63 }
 0x110   : > { %v1005_v19 = vmul.f32 %v1000_v5, %v995_v14  ;;  %v1006_v20 = vmul.f32 %v1004_v7, %v995_v14 }
 0x111   : > { %v959_v10 = vadd.f32 %v957_v3, %v919_v0  ;;  %v960_v11 = vadd.f32 %v958_v1, %v920_v2 }
 0x112   : > { %v979_v45 = vpop.permute.xlu1 %978 }
 0x113   : > { %v975_v15 = vadd.f32 %v973_v44, %v959_v10  ;;  %v976_v16 = vadd.f32 %v974_v12, %v960_v11  ;;  %v989_v6 = vmul.f32 %v984_v8, %v979_v45  ;;  %v990_v17 = vmul.f32 %v988_v9, %v979_v45 }
 0x115   : > { %v991_v21 = vadd.f32 %v989_v6, %v975_v15  ;;  %v992_v18 = vadd.f32 %v990_v17, %v976_v16 }
 0x117   : > { %v1013_v13 = vpop.permute.xlu1 %1012  ;;  %v1007_v22 = vadd.f32 %v1005_v19, %v991_v21  ;;  %v1008_v23 = vadd.f32 %v1006_v20, %v992_v18 }
 0x119   : > { %v1015_v61 = vadd.f32 %v1013_v13, %v1007_v22  ;;  %v1016_v24 = vadd.f32 %v1013_v13, %v1008_v23 }
 0x11b   : > { %vm1017_vm8 = vcmp.gt.f32.partialorder %v1015_v61, 0.0  ;;  %vm1018_vm9 = vcmp.gt.f32.partialorder %v1016_v24, 0.0  ;;  %v1019_v25 = vmul.f32 0.01, %v1015_v61  ;;  %v1020_v26 = vmul.f32 0.01, %v1016_v24 }
 0x11d   : > { %v1021_v29 = vsel %vm1017_vm8, %v1015_v61, %v1019_v25  ;;  %v1022_v27 = vsel %vm1018_vm9, %v1016_v24, %v1020_v26 }
 0x11e   : > { %1023 = vst [vmem:[%s197_s28] sm:$0xff] %v1021_v29  ;;  %1024 = vst [vmem:[%s197_s28 + $0x8] sm:$0xff] %v1022_v27 }
 0x11f PF: > { %s14_s15 = sadd.s32 1, %s1197_s15  }
 0x120   : > { %p11_p4 = scmp.ge.s32.totalorder %s14_s15, 4  }
 0x122   :  { %13 = sbr.rel (!%p11_p4) target bundleno = 1 (0x1), region = 73 }

</bundles_post_ra>
